<compile_context>
chip_gen: v6e
topology: v6e:2x2x1
jax: 0.10.0
libtpu: 0.0.40
codegen_flags: <defaults>
</compile_context>

<pallas_src>
import functools

import jax
import jax.numpy as jnp
from jax import lax
from jax.experimental import pallas as pl
from jax.experimental.pallas import tpu as pltpu


def _lstm_decode_kernel(x_ref, h0_ref, c0_ref, wx_ref, wh_ref, b_ref,
                        h_seq_ref, c_out_ref,
                        h_scr, c_scr, *, tc, hidden):
    """One grid step == Tc LSTMCell timesteps (unrolled inner loop).

    Weights/bias have constant block indices (VMEM-resident across the grid);
    h and c live in f32 VMEM scratch across grid iterations.
    """
    chunk = pl.program_id(0)
    H = hidden

    @pl.when(chunk == 0)
    def _():
        h_scr[...] = h0_ref[...].astype(jnp.float32)
        c_scr[...] = c0_ref[...].astype(jnp.float32)

    def step(i, carry):
        x_t = x_ref[i]                       # (B, H), already in compute dtype
        h_prev = h_scr[...]                  # f32 carry

        # Two accumulating MXU passes; all accumulation in f32.
        gates = (jnp.dot(x_t, wx_ref[...],
                         preferred_element_type=jnp.float32)
                 + jnp.dot(h_prev.astype(wh_ref.dtype), wh_ref[...],
                           preferred_element_type=jnp.float32)
                 + b_ref[...])

        # PyTorch LSTMCell gate order: input, forget, cell(g), output.
        i_g = jax.nn.sigmoid(gates[:, 0 * H:1 * H])
        f_g = jax.nn.sigmoid(gates[:, 1 * H:2 * H])
        g_g = jnp.tanh(gates[:, 2 * H:3 * H])
        o_g = jax.nn.sigmoid(gates[:, 3 * H:4 * H])

        c_new = f_g * c_scr[...] + i_g * g_g     # f32 epilogue on all chips
        h_new = o_g * jnp.tanh(c_new)

        h_scr[...] = h_new
        c_scr[...] = c_new
        h_seq_ref[i] = h_new.astype(h_seq_ref.dtype)
        return carry

    lax.fori_loop(0, tc, step, 0, unroll=True)

    # Final cell state: resident output block, stored only on the last chunk.
    @pl.when(chunk == pl.num_programs(0) - 1)
    def _():
        c_out_ref[...] = c_scr[...].astype(c_out_ref.dtype)


def preprocess_params(params, compute_dtype=jnp.bfloat16):
    """One-time parameter prep (hoisted out of the decode loop).

    Returns Wx = W_ih^T (H, 4H) and Wh = W_hh^T (H, 4H) in the MXU compute
    dtype, plus the combined bias (1, 4H) in f32.
    """
    w_ih, w_hh = params["w_ih"], params["w_hh"]            # (4H, H) each
    H = w_ih.shape[1]
    wx = w_ih.T.astype(compute_dtype)                      # (H, 4H)
    wh = w_hh.T.astype(compute_dtype)                      # (H, 4H)
    bias = (params["b_ih"].astype(jnp.float32)
            + params["b_hh"].astype(jnp.float32)).reshape(1, 4 * H)
    return {"wx": wx, "wh": wh, "bias": bias}


def _pick_time_chunk(T):
    for cand in (16, 8, 4, 2, 1):
        if T % cand == 0:
            return cand
    return 1


def sentence_decoder_decode(x_seq, s_hx, s_cx, prep, tc=None):
    """Run T LSTMCell steps in one pallas_call (time chunked by Tc).

    x_seq: (T, B, H) inputs (w_hx per step); s_hx/s_cx: (B, H) initial state.
    Returns (h_seq (T, B, H), c_final (B, H)).
    """
    T, B, H = x_seq.shape
    assert H % 128 == 0, "hidden size must be a multiple of 128 (lane tile)"
    assert B % 8 == 0, "batch must be a multiple of 8 (sublane tile)"

    if tc is None:
        tc = _pick_time_chunk(T)
    assert T % tc == 0

    wx, wh, bias = prep["wx"], prep["wh"], prep["bias"]
    compute_dtype = wx.dtype
    out_dtype = s_hx.dtype
    cd_bytes = jnp.dtype(compute_dtype).itemsize
    od_bytes = jnp.dtype(out_dtype).itemsize

    # Pre-cast x so the kernel does no per-step input cast and the per-step
    # HBM->VMEM traffic is in the compute dtype.
    x_cd = x_seq.astype(compute_dtype)

    # Tight VMEM budget from the actual footprint (+ headroom for compiler
    # internal scratch); everything is double-buffered by default.
    w_bytes = 2 * H * 4 * H * cd_bytes                      # Wx + Wh
    x_blk = tc * B * H * cd_bytes
    h_blk = tc * B * H * od_bytes
    state_blk = 3 * B * H * od_bytes + 4 * H * 4            # h0, c0, c_out, bias
    scratch = 2 * B * H * 4
    footprint = 2 * (w_bytes + x_blk + h_blk + state_blk) + scratch
    vmem_limit = int(min(max(footprint + (2 << 20), 4 << 20), 64 << 20))

    cost = pl.CostEstimate(
        flops=int(T * (16 * B * H * H + 10 * B * H)),
        transcendentals=int(T * 5 * B * H),
        bytes_accessed=int(T * B * H * (cd_bytes + od_bytes)
                           + w_bytes + 4 * H * 4 + 3 * B * H * od_bytes),
    )

    kernel = functools.partial(_lstm_decode_kernel, tc=tc, hidden=H)

    h_seq, c_fin = pl.pallas_call(
        kernel,
        out_shape=(
            jax.ShapeDtypeStruct((T, B, H), out_dtype),
            jax.ShapeDtypeStruct((B, H), out_dtype),
        ),
        grid_spec=pltpu.PrefetchScalarGridSpec(
            num_scalar_prefetch=0,
            grid=(T // tc,),
            in_specs=[
                pl.BlockSpec((tc, B, H), lambda t: (t, 0, 0)),   # x chunk
                pl.BlockSpec((B, H), lambda t: (0, 0)),          # h0 (resident)
                pl.BlockSpec((B, H), lambda t: (0, 0)),          # c0 (resident)
                pl.BlockSpec((H, 4 * H), lambda t: (0, 0)),      # Wx (resident)
                pl.BlockSpec((H, 4 * H), lambda t: (0, 0)),      # Wh (resident)
                pl.BlockSpec((1, 4 * H), lambda t: (0, 0)),      # bias (resident)
            ],
            out_specs=(
                pl.BlockSpec((tc, B, H), lambda t: (t, 0, 0)),   # h per chunk
                pl.BlockSpec((B, H), lambda t: (0, 0)),          # final c
            ),
            scratch_shapes=[
                pltpu.VMEM((B, H), jnp.float32),                 # h carry (f32)
                pltpu.VMEM((B, H), jnp.float32),                 # c carry (f32)
            ],
        ),
        compiler_params=pltpu.CompilerParams(
            dimension_semantics=("arbitrary",),   # recurrence over time chunks
            vmem_limit_bytes=vmem_limit,
        ),
        cost_estimate=cost,
    )(x_cd, s_hx, s_cx, wx, wh, bias)
    return h_seq, c_fin


def sentence_decoder_forward(w_hx, s_hx, s_cx, prep):
    """Single LSTMCell step, matching SentenceDecoder.forward semantics."""
    h_seq, c_new = sentence_decoder_decode(w_hx[None], s_hx, s_cx, prep, tc=1)
    return h_seq[0], c_new


def init_params(key, hidden_size, dtype=jnp.float32):
    """Deterministic init matching nn.LSTMCell shapes: U(-1/sqrt(H), 1/sqrt(H))."""
    k1, k2, k3, k4 = jax.random.split(key, 4)
    bound = 1.0 / (hidden_size ** 0.5)
    u = lambda k, shape: jax.random.uniform(k, shape, dtype, -bound, bound)
    return {
        "w_ih": u(k1, (4 * hidden_size, hidden_size)),
        "w_hh": u(k2, (4 * hidden_size, hidden_size)),
        "b_ih": u(k3, (4 * hidden_size,)),
        "b_hh": u(k4, (4 * hidden_size,)),
    }


def _reference_step(params, x, h, c):
    """Pure-JAX reference of torch.nn.LSTMCell."""
    H = h.shape[-1]
    gates = (x @ params["w_ih"].T + params["b_ih"]
             + h @ params["w_hh"].T + params["b_hh"])
    i = jax.nn.sigmoid(gates[:, 0 * H:1 * H])
    f = jax.nn.sigmoid(gates[:, 1 * H:2 * H])
    g = jnp.tanh(gates[:, 2 * H:3 * H])
    o = jax.nn.sigmoid(gates[:, 3 * H:4 * H])
    c = f * c + i * g
    h = o * jnp.tanh(c)
    return h, c


def _reference_decode(x_seq, h, c, params):
    hs = []
    for t in range(x_seq.shape[0]):
        h, c = _reference_step(params, x_seq[t], h, c)
        hs.append(h)
    return jnp.stack(hs, axis=0), c


if __name__ == "__main__":
    batch, hidden, steps = 8, 128, 16    # lane-dense: B % 8 == 0, H % 128 == 0
    key = jax.random.PRNGKey(0)
    kp, kx, kh, kc = jax.random.split(key, 4)

    params = init_params(kp, hidden)
    x_seq = jax.random.normal(kx, (steps, batch, hidden), jnp.float32)
    s_hx = jax.random.normal(kh, (batch, hidden), jnp.float32)
    s_cx = jax.random.normal(kc, (batch, hidden), jnp.float32)

    # --- exact-precision path (f32 weights): single step, matches the module.
    prep_f32 = preprocess_params(params, compute_dtype=jnp.float32)
    fwd = jax.jit(sentence_decoder_forward)
    h1, c1 = fwd(x_seq[0], s_hx, s_cx, prep_f32)
    jax.block_until_ready((h1, c1))
    h1_ref, c1_ref = _reference_step(params, x_seq[0], s_hx, s_cx)
    assert jnp.allclose(h1, h1_ref, atol=1e-4, rtol=1e-4)
    assert jnp.allclose(c1, c1_ref, atol=1e-4, rtol=1e-4)

    # --- fast path (bf16 weights + activations on the MXU, f32 accumulate /
    #     epilogue / state carry): multi-step decode, weights VMEM-resident,
    #     Tc timesteps per grid iteration.
    prep_bf16 = preprocess_params(params, compute_dtype=jnp.bfloat16)
    decode = jax.jit(sentence_decoder_decode)
    h_seq, c_fin = decode(x_seq, s_hx, s_cx, prep_bf16)
    jax.block_until_ready((h_seq, c_fin))
    h_seq_ref, c_fin_ref = _reference_decode(x_seq, s_hx, s_cx, params)
    assert jnp.allclose(h_seq, h_seq_ref, atol=3e-2, rtol=3e-2)
    assert jnp.allclose(c_fin, c_fin_ref, atol=3e-2, rtol=3e-2)

    print("KERNEL_OK")
</pallas_src>

<mosaic_0001>
module attributes {stable_mosaic.version = 11 : i64} {
  func.func @_lstm_decode_kernel(%arg0: i32, %arg1: memref<1x8x128xf32, #tpu.memory_space<vmem>>, %arg2: memref<8x128xf32, #tpu.memory_space<vmem>>, %arg3: memref<8x128xf32, #tpu.memory_space<vmem>>, %arg4: memref<128x512xf32, #tpu.memory_space<vmem>>, %arg5: memref<128x512xf32, #tpu.memory_space<vmem>>, %arg6: memref<1x512xf32, #tpu.memory_space<vmem>>, %arg7: memref<1x8x128xf32, #tpu.memory_space<vmem>>, %arg8: memref<8x128xf32, #tpu.memory_space<vmem>>, %arg9: memref<8x128xf32, #tpu.memory_space<vmem>>, %arg10: memref<8x128xf32, #tpu.memory_space<vmem>>) attributes {dimension_semantics = [#tpu.dimension_semantics<arbitrary>], iteration_bounds = array<i64: 1>, scalar_prefetch = 0 : i64, scratch_operands = 2 : i64, tpu.core_type = #tpu.core_type<tc>, window_params = [{transform_indices = @transform_0, window_bounds = array<i64: 1, 8, 128>}, {pipeline_mode = #tpu.pipeline_mode<synchronous>, transform_indices = @transform_1, window_bounds = array<i64: 8, 128>}, {pipeline_mode = #tpu.pipeline_mode<synchronous>, transform_indices = @transform_2, window_bounds = array<i64: 8, 128>}, {pipeline_mode = #tpu.pipeline_mode<synchronous>, transform_indices = @transform_3, window_bounds = array<i64: 128, 512>}, {pipeline_mode = #tpu.pipeline_mode<synchronous>, transform_indices = @transform_4, window_bounds = array<i64: 128, 512>}, {pipeline_mode = #tpu.pipeline_mode<synchronous>, transform_indices = @transform_5, window_bounds = array<i64: 1, 512>}, {transform_indices = @transform_6, window_bounds = array<i64: 1, 8, 128>}, {pipeline_mode = #tpu.pipeline_mode<synchronous>, transform_indices = @transform_7, window_bounds = array<i64: 8, 128>}]} {
    %c0_i32 = arith.constant 0 : i32
    %0 = arith.cmpi eq, %arg0, %c0_i32 : i32
    %1 = arith.extui %0 : i1 to i32
    %c0_i32_0 = arith.constant 0 : i32
    %2 = arith.cmpi ne, %1, %c0_i32_0 : i32
    scf.if %2 {
      %c0_25 = arith.constant 0 : index
      %c0_26 = arith.constant 0 : index
      %50 = vector.load %arg2[%c0_25, %c0_26] : memref<8x128xf32, #tpu.memory_space<vmem>>, vector<8x128xf32>
      %c0_27 = arith.constant 0 : index
      %c0_28 = arith.constant 0 : index
      %51 = vector.load %arg9[%c0_27, %c0_28] : memref<8x128xf32, #tpu.memory_space<vmem>>, vector<8x128xf32>
      tpu.vector_store %arg9[%c0_27, %c0_28], %50 {strides = array<i32>} : memref<8x128xf32, #tpu.memory_space<vmem>>, vector<8x128xf32>,
      %c0_29 = arith.constant 0 : index
      %c0_30 = arith.constant 0 : index
      %52 = vector.load %arg3[%c0_29, %c0_30] : memref<8x128xf32, #tpu.memory_space<vmem>>, vector<8x128xf32>
      %c0_31 = arith.constant 0 : index
      %c0_32 = arith.constant 0 : index
      %53 = vector.load %arg10[%c0_31, %c0_32] : memref<8x128xf32, #tpu.memory_space<vmem>>, vector<8x128xf32>
      tpu.vector_store %arg10[%c0_31, %c0_32], %52 {strides = array<i32>} : memref<8x128xf32, #tpu.memory_space<vmem>>, vector<8x128xf32>,
    } else {
    }
    %c0_i32_1 = arith.constant 0 : i32
    %3 = arith.index_cast %c0_i32_1 : i32 to index
    %c0 = arith.constant 0 : index
    %c0_2 = arith.constant 0 : index
    %4 = vector.load %arg1[%3, %c0, %c0_2] : memref<1x8x128xf32, #tpu.memory_space<vmem>>, vector<1x8x128xf32>
    %5 = vector.shape_cast %4 : vector<1x8x128xf32> to vector<8x128xf32>
    %c0_3 = arith.constant 0 : index
    %c0_4 = arith.constant 0 : index
    %6 = vector.load %arg9[%c0_3, %c0_4] : memref<8x128xf32, #tpu.memory_space<vmem>>, vector<8x128xf32>
    %c0_5 = arith.constant 0 : index
    %c0_6 = arith.constant 0 : index
    %7 = vector.load %arg4[%c0_5, %c0_6] : memref<128x512xf32, #tpu.memory_space<vmem>>, vector<128x512xf32>
    %cst = arith.constant dense<0.000000e+00> : vector<8x512xf32>
    %8 = tpu.matmul %5, %7, %cst {dimension_numbers = #tpu.dot_dimension_numbers<[1], [0], [0], [1], [0, 0, 1, 1], [], []>} : vector<8x128xf32>, vector<128x512xf32>, vector<8x512xf32> -> vector<8x512xf32>
    %c0_7 = arith.constant 0 : index
    %c0_8 = arith.constant 0 : index
    %9 = vector.load %arg5[%c0_7, %c0_8] : memref<128x512xf32, #tpu.memory_space<vmem>>, vector<128x512xf32>
    %cst_9 = arith.constant dense<0.000000e+00> : vector<8x512xf32>
    %10 = tpu.matmul %6, %9, %cst_9 {dimension_numbers = #tpu.dot_dimension_numbers<[1], [0], [0], [1], [0, 0, 1, 1], [], []>} : vector<8x128xf32>, vector<128x512xf32>, vector<8x512xf32> -> vector<8x512xf32>
    %11 = arith.addf %8, %10 : vector<8x512xf32>
    %c0_10 = arith.constant 0 : index
    %c0_11 = arith.constant 0 : index
    %12 = vector.load %arg6[%c0_10, %c0_11] : memref<1x512xf32, #tpu.memory_space<vmem>>, vector<1x512xf32>
    %13 = vector.broadcast %12 : vector<1x512xf32> to vector<8x512xf32>
    %14 = arith.addf %11, %13 : vector<8x512xf32>
    %15 = vector.extract_strided_slice %14 {offsets = [0, 0], sizes = [8, 128], strides = [1, 1]} : vector<8x512xf32> to vector<8x128xf32>
    %16 = arith.negf %15 : vector<8x128xf32>
    %17 = math.exp %16 : vector<8x128xf32>
    %cst_12 = arith.constant 1.000000e+00 : f32
    %18 = vector.broadcast %cst_12 : f32 to vector<8x128xf32>
    %19 = arith.addf %18, %17 : vector<8x128xf32>
    %20 = arith.divf %18, %19 : vector<8x128xf32>
    %21 = vector.extract_strided_slice %14 {offsets = [0, 128], sizes = [8, 128], strides = [1, 1]} : vector<8x512xf32> to vector<8x128xf32>
    %22 = arith.negf %21 : vector<8x128xf32>
    %23 = math.exp %22 : vector<8x128xf32>
    %cst_13 = arith.constant 1.000000e+00 : f32
    %24 = vector.broadcast %cst_13 : f32 to vector<8x128xf32>
    %25 = arith.addf %24, %23 : vector<8x128xf32>
    %26 = arith.divf %24, %25 : vector<8x128xf32>
    %27 = vector.extract_strided_slice %14 {offsets = [0, 256], sizes = [8, 128], strides = [1, 1]} : vector<8x512xf32> to vector<8x128xf32>
    %28 = math.tanh %27 : vector<8x128xf32>
    %29 = vector.extract_strided_slice %14 {offsets = [0, 384], sizes = [8, 128], strides = [1, 1]} : vector<8x512xf32> to vector<8x128xf32>
    %30 = arith.negf %29 : vector<8x128xf32>
    %31 = math.exp %30 : vector<8x128xf32>
    %cst_14 = arith.constant 1.000000e+00 : f32
    %32 = vector.broadcast %cst_14 : f32 to vector<8x128xf32>
    %33 = arith.addf %32, %31 : vector<8x128xf32>
    %34 = arith.divf %32, %33 : vector<8x128xf32>
    %c0_15 = arith.constant 0 : index
    %c0_16 = arith.constant 0 : index
    %35 = vector.load %arg10[%c0_15, %c0_16] : memref<8x128xf32, #tpu.memory_space<vmem>>, vector<8x128xf32>
    %36 = arith.mulf %26, %35 : vector<8x128xf32>
    %37 = arith.mulf %20, %28 : vector<8x128xf32>
    %38 = arith.addf %36, %37 : vector<8x128xf32>
    %39 = math.tanh %38 : vector<8x128xf32>
    %40 = arith.mulf %34, %39 : vector<8x128xf32>
    %c0_17 = arith.constant 0 : index
    %c0_18 = arith.constant 0 : index
    %41 = vector.load %arg9[%c0_17, %c0_18] : memref<8x128xf32, #tpu.memory_space<vmem>>, vector<8x128xf32>
    tpu.vector_store %arg9[%c0_17, %c0_18], %40 {strides = array<i32>} : memref<8x128xf32, #tpu.memory_space<vmem>>, vector<8x128xf32>,
    %c0_19 = arith.constant 0 : index
    %c0_20 = arith.constant 0 : index
    %42 = vector.load %arg10[%c0_19, %c0_20] : memref<8x128xf32, #tpu.memory_space<vmem>>, vector<8x128xf32>
    tpu.vector_store %arg10[%c0_19, %c0_20], %38 {strides = array<i32>} : memref<8x128xf32, #tpu.memory_space<vmem>>, vector<8x128xf32>,
    %43 = arith.index_cast %c0_i32_1 : i32 to index
    %c0_21 = arith.constant 0 : index
    %c0_22 = arith.constant 0 : index
    %44 = vector.load %arg7[%43, %c0_21, %c0_22] : memref<1x8x128xf32, #tpu.memory_space<vmem>>, vector<1x8x128xf32>
    %45 = vector.shape_cast %44 : vector<1x8x128xf32> to vector<8x128xf32>
    %46 = vector.shape_cast %40 : vector<8x128xf32> to vector<1x8x128xf32>
    tpu.vector_store %arg7[%43, %c0_21, %c0_22], %46 {strides = array<i32>} : memref<1x8x128xf32, #tpu.memory_space<vmem>>, vector<1x8x128xf32>,
    %c1_i32 = arith.constant 1 : i32
    %c0_i32_23 = arith.constant 0 : i32
    %47 = arith.cmpi eq, %arg0, %c0_i32_23 : i32
    %48 = arith.extui %47 : i1 to i32
    %c0_i32_24 = arith.constant 0 : i32
    %49 = arith.cmpi ne, %48, %c0_i32_24 : i32
    scf.if %49 {
      %c0_25 = arith.constant 0 : index
      %c0_26 = arith.constant 0 : index
      %50 = vector.load %arg10[%c0_25, %c0_26] : memref<8x128xf32, #tpu.memory_space<vmem>>, vector<8x128xf32>
      %c0_27 = arith.constant 0 : index
      %c0_28 = arith.constant 0 : index
      %51 = vector.load %arg8[%c0_27, %c0_28] : memref<8x128xf32, #tpu.memory_space<vmem>>, vector<8x128xf32>
      tpu.vector_store %arg8[%c0_27, %c0_28], %50 {strides = array<i32>} : memref<8x128xf32, #tpu.memory_space<vmem>>, vector<8x128xf32>,
    } else {
    }
    return
  }
  func.func @transform_0(%arg0: i32) -> (i32, i32, i32) {
    %c0_i32 = arith.constant 0 : i32
    %c0_i32_0 = arith.constant 0 : i32
    %c0_i32_1 = arith.constant 0 : i32
    return %arg0, %c0_i32, %c0_i32_0 : i32, i32, i32
  }
  func.func @transform_1(%arg0: i32) -> (i32, i32) {
    %c0_i32 = arith.constant 0 : i32
    %c0_i32_0 = arith.constant 0 : i32
    %c0_i32_1 = arith.constant 0 : i32
    return %c0_i32, %c0_i32_0 : i32, i32
  }
  func.func @transform_2(%arg0: i32) -> (i32, i32) {
    %c0_i32 = arith.constant 0 : i32
    %c0_i32_0 = arith.constant 0 : i32
    %c0_i32_1 = arith.constant 0 : i32
    return %c0_i32, %c0_i32_0 : i32, i32
  }
  func.func @transform_3(%arg0: i32) -> (i32, i32) {
    %c0_i32 = arith.constant 0 : i32
    %c0_i32_0 = arith.constant 0 : i32
    %c0_i32_1 = arith.constant 0 : i32
    return %c0_i32, %c0_i32_0 : i32, i32
  }
  func.func @transform_4(%arg0: i32) -> (i32, i32) {
    %c0_i32 = arith.constant 0 : i32
    %c0_i32_0 = arith.constant 0 : i32
    %c0_i32_1 = arith.constant 0 : i32
    return %c0_i32, %c0_i32_0 : i32, i32
  }
  func.func @transform_5(%arg0: i32) -> (i32, i32) {
    %c0_i32 = arith.constant 0 : i32
    %c0_i32_0 = arith.constant 0 : i32
    %c0_i32_1 = arith.constant 0 : i32
    return %c0_i32, %c0_i32_0 : i32, i32
  }
  func.func @transform_6(%arg0: i32) -> (i32, i32, i32) {
    %c0_i32 = arith.constant 0 : i32
    %c0_i32_0 = arith.constant 0 : i32
    %c0_i32_1 = arith.constant 0 : i32
    return %arg0, %c0_i32, %c0_i32_0 : i32, i32, i32
  }
  func.func @transform_7(%arg0: i32) -> (i32, i32) {
    %c0_i32 = arith.constant 0 : i32
    %c0_i32_0 = arith.constant 0 : i32
    %c0_i32_1 = arith.constant 0 : i32
    return %c0_i32, %c0_i32_0 : i32, i32
  }
}

</mosaic_0001>

<bundles_post_ra>
// kernel: sentence_decoder_forward.1
= control target key start
LH: loop header
LB: loop body
LE: loop exit
PB: predicated region body
PF: predicated region fallthrough
CT: control target
= control target key end

     0   :  { %13 = vsyncpa [#allocation5], 0  ;;  %s864_s0 = inlined_call_operand.hbm [shape: f32[1,8,128], index: 0, kind: input, shape index: {}]   ;;  %s865_s1 = inlined_call_operand.hbm [shape: f32[8,128], index: 1, kind: input, shape index: {}]   ;;  %s866_s2 = inlined_call_operand.hbm [shape: f32[8,128], index: 2, kind: input, shape index: {}]   ;;  %s867_s3 = inlined_call_operand.hbm [shape: f32[128,512], index: 3, kind: input, shape index: {}]   ;;  %s868_s4 = inlined_call_operand.hbm [shape: f32[128,512], index: 4, kind: input, shape index: {}]   ;;  %s869_s5 = inlined_call_operand.vmem [shape: f32[1,512], index: 5, kind: input, shape index: {}]   ;;  %s870_s6 = inlined_call_operand.hbm [shape: f32[1,8,128], index: 6, kind: output, shape index: {0}]   ;;  %s871_s7 = inlined_call_operand.hbm [shape: f32[8,128], index: 7, kind: output, shape index: {1}]  }
   0x1   :  { %14 = vsyncpa [#allocation8], 0 }
   0x2   :  { %15 = vsyncpa [#allocation11], 0 }
   0x3   :  { %16 = vsyncpa [#allocation6], 0 }
   0x4   :  { %17 = vsyncpa [#allocation15], 0  ;;  %s780_s24 = smov [#allocation7]   ;;  %s781_s26 = smov [#allocation10]  }
   0x5   :  { %s34_s25 = sshll.u32 %s780_s24, 4  ;;  %s53_s27 = sshll.u32 %s781_s26, 4  ;;  %s35_s25 = int_to_ptr.vmem [resolvable:$true] %s34_s25  ;;  %s54_s27 = int_to_ptr.vmem [resolvable:$true] %s53_s27 }
   0x6   :  { %s638_s28 = scalar_lea.vmem %s35_s25, 128  ;;  %p643_p1 = scmp.lt.s32.totalorder %s35_s25, %s35_s25 }
   0x7   :  { %p639_p0 = scmp.ne.s32.totalorder %s35_s25, %s638_s28  ;;  %p644_p2 = scmp.lt.s32.totalorder %s638_s28, %s638_s28 }
   0x9   :  { %p645_p3 = por %p644_p2, %p643_p1 }
   0xb   :  { %p646_p4 = pnand %p645_p3, %p639_p0 }
   0xd   :  { %649 = shalt.err (!%p646_p4)
}
   0xe   :  { %37 = dma.hbm_to_vmem [thread:$0]  %s865_s1, 128, %s35_s25, [#allocation8]  }
   0xf   :  { %s658_s8 = scalar_lea.vmem %s54_s27, 8192  ;;  %p663_p6 = scmp.lt.s32.totalorder %s54_s27, %s54_s27 }
  0x10   :  { %p659_p5 = scmp.ne.s32.totalorder %s54_s27, %s658_s8  ;;  %p664_p7 = scmp.lt.s32.totalorder %s658_s8, %s658_s8 }
  0x12   :  { %p665_p8 = por %p664_p7, %p663_p6 }
  0x14   :  { %p666_p9 = pnand %p665_p8, %p659_p5 }
  0x16   :  { %669 = shalt.err (!%p666_p9)
}
  0x17   :  { %s782_s9 = smov 512   ;;  %s783_s10 = smov 32  }
  0x18   :  { %59 = dma.hbm_to_vmem [thread:$0]  %s867_s3, 8192, %s54_s27, [#allocation11], %s782_s9, %s782_s9, %s783_s10  }
  0x19   :  { %s784_s13 = smov [#allocation4]   ;;  %s785_s15 = smov [#allocation9]  }
  0x1a   :  { %s24_s14 = sshll.u32 %s784_s13, 4  ;;  %s44_s1 = sshll.u32 %s785_s15, 4  ;;  %s25_s14 = int_to_ptr.vmem [resolvable:$true] %s24_s14  ;;  %s45_s1 = int_to_ptr.vmem [resolvable:$true] %s44_s1 }
  0x1b   :  { %s678_s16 = scalar_lea.vmem %s25_s14, 128  ;;  %p683_p11 = scmp.lt.s32.totalorder %s25_s14, %s25_s14 }
  0x1c   :  { %p679_p10 = scmp.ne.s32.totalorder %s25_s14, %s678_s16  ;;  %p684_p12 = scmp.lt.s32.totalorder %s678_s16, %s678_s16 }
  0x1e   :  { %p685_p13 = por %p684_p12, %p683_p11 }
  0x20   :  { %p686_p0 = pnand %p685_p13, %p679_p10 }
  0x22   :  { %689 = shalt.err (!%p686_p0)
}
  0x23   :  { %27 = dma.hbm_to_vmem [thread:$0]  %s864_s0, 128, %s25_s14, [#allocation5]  }
  0x24   :  { %s698_s19 = scalar_lea.vmem %s45_s1, 128  ;;  %p703_p2 = scmp.lt.s32.totalorder %s45_s1, %s45_s1 }
  0x25   :  { %p699_p1 = scmp.ne.s32.totalorder %s45_s1, %s698_s19  ;;  %p704_p3 = scmp.lt.s32.totalorder %s698_s19, %s698_s19 }
  0x27   :  { %p705_p4 = por %p704_p3, %p703_p2 }
  0x29   :  { %p706_p5 = pnand %p705_p4, %p699_p1 }
  0x2b   :  { %709 = shalt.err (!%p706_p5)
}
  0x2c   :  { %47 = dma.hbm_to_vmem [thread:$0]  %s866_s2, 128, %s45_s1, [#allocation8]  }
  0x2d   :  { %s786_s21 = smov [#allocation12]  }
  0x2e   :  { %s65_s22 = sshll.u32 %s786_s21, 4  ;;  %s66_s22 = int_to_ptr.vmem [resolvable:$true] %s65_s22 }
  0x2f   :  { %s718_s23 = scalar_lea.vmem %s66_s22, 8192  ;;  %p723_p7 = scmp.lt.s32.totalorder %s66_s22, %s66_s22 }
  0x30   :  { %p719_p6 = scmp.ne.s32.totalorder %s66_s22, %s718_s23  ;;  %p724_p8 = scmp.lt.s32.totalorder %s718_s23, %s718_s23 }
  0x32   :  { %p725_p9 = por %p724_p8, %p723_p7 }
  0x34   :  { %p726_p10 = pnand %p725_p9, %p719_p6 }
  0x36   :  { %729 = shalt.err (!%p726_p10)
}
  0x37   :  { %71 = dma.hbm_to_vmem [thread:$0]  %s868_s4, 8192, %s66_s22, [#allocation11], %s782_s9, %s782_s9, %s783_s10  }
  0x38   :  { %770 = dma.done.wait [#allocation5], 128  }
  0x39   :  { %771 = vsyncadd [#allocation5], 4294967168 }
  0x3a   :  { %772 = dma.done.wait [#allocation8], 256  }
  0x3b   :  { %773 = vsyncadd [#allocation8], 4294967040 }
  0x3c   :  { %774 = dma.done.wait [#allocation11], 16384  }
  0x3d   :  { %775 = vsyncadd [#allocation11], 4294950912  ;;  %v787_v0 = vmov 0.0   ;;  %v224_v1 = vld [vmem:[#allocation12 + $0x1e8] sm:$0xff]  ;;  %v226_v2 = vld [vmem:[#allocation12 + $0x1f8] sm:$0xff] }
  0x3e   :  { %291 = vmatprep.mubr.f32.mxu0 %v787_v0  ;;  %362 = vmatprep.mubr.f32.mxu1 %v787_v0  ;;  %v223_v3 = vld [vmem:[#allocation12 + $0x1e0] sm:$0xff]  ;;  %v225_v4 = vld [vmem:[#allocation12 + $0x1f0] sm:$0xff]  ;;  %v220_v5 = vld [vmem:[#allocation12 + $0x1c8] sm:$0xff] }
  0x3f   :  { %227 = vmatprep.subr.mxu0 %v224_v1  ;;  %298 = vmatprep.subr.mxu1 %v226_v2  ;;  %v222_v6 = vld [vmem:[#allocation12 + $0x1d8] sm:$0xff]  ;;  %v219_v7 = vld [vmem:[#allocation12 + $0x1c0] sm:$0xff]  ;;  %v221_v8 = vld [vmem:[#allocation12 + $0x1d0] sm:$0xff] }
  0x40   :  { %228 = vmatpush1.msra.mxu0 %v223_v3  ;;  %299 = vmatpush1.msra.mxu1 %v225_v4  ;;  %v216_v9 = vld [vmem:[#allocation12 + $0x1a8] sm:$0xff]  ;;  %v218_v10 = vld [vmem:[#allocation12 + $0x1b8] sm:$0xff]  ;;  %v215_v11 = vld [vmem:[#allocation12 + $0x1a0] sm:$0xff] }
  0x41   :  { %229 = vmatprep.subr.mxu0 %v220_v5  ;;  %300 = vmatprep.subr.mxu1 %v222_v6  ;;  %v217_v12 = vld [vmem:[#allocation12 + $0x1b0] sm:$0xff]  ;;  %v212_v13 = vld [vmem:[#allocation12 + $0x188] sm:$0xff]  ;;  %v214_v14 = vld [vmem:[#allocation12 + $0x198] sm:$0xff] }
  0x42   :  { %230 = vmatpush1.msra.mxu0 %v219_v7  ;;  %301 = vmatpush1.msra.mxu1 %v221_v8  ;;  %v211_v15 = vld [vmem:[#allocation12 + $0x180] sm:$0xff]  ;;  %v213_v16 = vld [vmem:[#allocation12 + $0x190] sm:$0xff]  ;;  %v208_v17 = vld [vmem:[#allocation12 + $0x168] sm:$0xff] }
  0x43   :  { %231 = vmatprep.subr.mxu0 %v216_v9  ;;  %302 = vmatprep.subr.mxu1 %v218_v10  ;;  %v210_v18 = vld [vmem:[#allocation12 + $0x178] sm:$0xff]  ;;  %v207_v19 = vld [vmem:[#allocation12 + $0x160] sm:$0xff]  ;;  %v209_v20 = vld [vmem:[#allocation12 + $0x170] sm:$0xff] }
  0x44   :  { %232 = vmatpush1.msra.mxu0 %v215_v11  ;;  %303 = vmatpush1.msra.mxu1 %v217_v12  ;;  %v204_v21 = vld [vmem:[#allocation12 + $0x148] sm:$0xff]  ;;  %v206_v22 = vld [vmem:[#allocation12 + $0x158] sm:$0xff]  ;;  %v203_v23 = vld [vmem:[#allocation12 + $0x140] sm:$0xff] }
  0x45   :  { %233 = vmatprep.subr.mxu0 %v212_v13  ;;  %304 = vmatprep.subr.mxu1 %v214_v14  ;;  %v205_v24 = vld [vmem:[#allocation12 + $0x150] sm:$0xff]  ;;  %v200_v25 = vld [vmem:[#allocation12 + $0x128] sm:$0xff]  ;;  %v202_v26 = vld [vmem:[#allocation12 + $0x138] sm:$0xff] }
  0x46   :  { %234 = vmatpush1.msra.mxu0 %v211_v15  ;;  %305 = vmatpush1.msra.mxu1 %v213_v16  ;;  %v199_v27 = vld [vmem:[#allocation12 + $0x120] sm:$0xff]  ;;  %v201_v28 = vld [vmem:[#allocation12 + $0x130] sm:$0xff]  ;;  %v196_v29 = vld [vmem:[#allocation12 + $0x108] sm:$0xff] }
  0x47   :  { %235 = vmatprep.subr.mxu0 %v208_v17  ;;  %306 = vmatprep.subr.mxu1 %v210_v18  ;;  %v198_v30 = vld [vmem:[#allocation12 + $0x118] sm:$0xff]  ;;  %v195_v31 = vld [vmem:[#allocation12 + $0x100] sm:$0xff]  ;;  %v197_v32 = vld [vmem:[#allocation12 + $0x110] sm:$0xff] }
  0x48   :  { %236 = vmatpush1.msra.mxu0 %v207_v19  ;;  %307 = vmatpush1.msra.mxu1 %v209_v20  ;;  %v192_v33 = vld [vmem:[#allocation12 + $0xe8] sm:$0xff]  ;;  %v194_v34 = vld [vmem:[#allocation12 + $0xf8] sm:$0xff]  ;;  %v191_v35 = vld [vmem:[#allocation12 + $0xe0] sm:$0xff] }
  0x49   :  { %237 = vmatprep.subr.mxu0 %v204_v21  ;;  %308 = vmatprep.subr.mxu1 %v206_v22  ;;  %v193_v36 = vld [vmem:[#allocation12 + $0xf0] sm:$0xff]  ;;  %v188_v37 = vld [vmem:[#allocation12 + $0xc8] sm:$0xff]  ;;  %v190_v38 = vld [vmem:[#allocation12 + $0xd8] sm:$0xff] }
  0x4a   :  { %238 = vmatpush1.msra.mxu0 %v203_v23  ;;  %309 = vmatpush1.msra.mxu1 %v205_v24  ;;  %v187_v39 = vld [vmem:[#allocation12 + $0xc0] sm:$0xff]  ;;  %v189_v40 = vld [vmem:[#allocation12 + $0xd0] sm:$0xff]  ;;  %v184_v41 = vld [vmem:[#allocation12 + $0xa8] sm:$0xff] }
  0x4b   :  { %239 = vmatprep.subr.mxu0 %v200_v25  ;;  %310 = vmatprep.subr.mxu1 %v202_v26  ;;  %v186_v42 = vld [vmem:[#allocation12 + $0xb8] sm:$0xff]  ;;  %v183_v43 = vld [vmem:[#allocation12 + $0xa0] sm:$0xff]  ;;  %v185_v44 = vld [vmem:[#allocation12 + $0xb0] sm:$0xff] }
  0x4c   :  { %240 = vmatpush1.msra.mxu0 %v199_v27  ;;  %311 = vmatpush1.msra.mxu1 %v201_v28  ;;  %v180_v45 = vld [vmem:[#allocation12 + $0x88] sm:$0xff]  ;;  %v182_v46 = vld [vmem:[#allocation12 + $0x98] sm:$0xff]  ;;  %v179_v47 = vld [vmem:[#allocation12 + $0x80] sm:$0xff] }
  0x4d   :  { %241 = vmatprep.subr.mxu0 %v196_v29  ;;  %312 = vmatprep.subr.mxu1 %v198_v30  ;;  %v181_v48 = vld [vmem:[#allocation12 + $0x90] sm:$0xff]  ;;  %v176_v49 = vld [vmem:[#allocation12 + $0x68] sm:$0xff]  ;;  %v178_v50 = vld [vmem:[#allocation12 + $0x78] sm:$0xff] }
  0x4e   :  { %242 = vmatpush1.msra.mxu0 %v195_v31  ;;  %313 = vmatpush1.msra.mxu1 %v197_v32  ;;  %v175_v51 = vld [vmem:[#allocation12 + $0x60] sm:$0xff]  ;;  %v177_v52 = vld [vmem:[#allocation12 + $0x70] sm:$0xff]  ;;  %v172_v53 = vld [vmem:[#allocation12 + $0x48] sm:$0xff] }
  0x4f   :  { %243 = vmatprep.subr.mxu0 %v192_v33  ;;  %314 = vmatprep.subr.mxu1 %v194_v34  ;;  %v174_v54 = vld [vmem:[#allocation12 + $0x58] sm:$0xff]  ;;  %v171_v55 = vld [vmem:[#allocation12 + $0x40] sm:$0xff]  ;;  %v173_v56 = vld [vmem:[#allocation12 + $0x50] sm:$0xff] }
  0x50   :  { %244 = vmatpush1.msra.mxu0 %v191_v35  ;;  %315 = vmatpush1.msra.mxu1 %v193_v36  ;;  %v168_v57 = vld [vmem:[#allocation12 + $0x28] sm:$0xff]  ;;  %v170_v58 = vld [vmem:[#allocation12 + $0x38] sm:$0xff]  ;;  %v167_v59 = vld [vmem:[#allocation12 + $0x20] sm:$0xff] }
  0x51   :  { %245 = vmatprep.subr.mxu0 %v188_v37  ;;  %316 = vmatprep.subr.mxu1 %v190_v38  ;;  %v169_v60 = vld [vmem:[#allocation12 + $0x30] sm:$0xff]  ;;  %v164_v61 = vld [vmem:[#allocation12 + $0x8] sm:$0xff]  ;;  %v166_v62 = vld [vmem:[#allocation12 + $0x18] sm:$0xff] }
  0x52   :  { %246 = vmatpush1.msra.mxu0 %v187_v39  ;;  %317 = vmatpush1.msra.mxu1 %v189_v40  ;;  %v163_v63 = vld [vmem:[#allocation12] sm:$0xff]  ;;  %v165_v1 = vld [vmem:[#allocation12 + $0x10] sm:$0xff]  ;;  %v160_v3 = vld [vmem:[#allocation10 + $0x1e8] sm:$0xff] }
  0x53   :  { %247 = vmatprep.subr.mxu0 %v184_v41  ;;  %318 = vmatprep.subr.mxu1 %v186_v42  ;;  %v93_v2 = vld [vmem:[#allocation7] sm:$0xff]  ;;  %v162_v4 = vld [vmem:[#allocation10 + $0x1f8] sm:$0xff]  ;;  %v159_v5 = vld [vmem:[#allocation10 + $0x1e0] sm:$0xff] }
  0x54   :  { %248 = vmatpush1.msra.mxu0 %v183_v43  ;;  %319 = vmatpush1.msra.mxu1 %v185_v44  ;;  %v161_v6 = vld [vmem:[#allocation10 + $0x1f0] sm:$0xff]  ;;  %v156_v7 = vld [vmem:[#allocation10 + $0x1c8] sm:$0xff]  ;;  %v158_v8 = vld [vmem:[#allocation10 + $0x1d8] sm:$0xff] }
  0x55   :  { %249 = vmatprep.subr.mxu0 %v180_v45  ;;  %320 = vmatprep.subr.mxu1 %v182_v46  ;;  %v155_v9 = vld [vmem:[#allocation10 + $0x1c0] sm:$0xff]  ;;  %v157_v10 = vld [vmem:[#allocation10 + $0x1d0] sm:$0xff]  ;;  %v152_v11 = vld [vmem:[#allocation10 + $0x1a8] sm:$0xff] }
  0x56   :  { %250 = vmatpush1.msra.mxu0 %v179_v47  ;;  %321 = vmatpush1.msra.mxu1 %v181_v48  ;;  %v154_v12 = vld [vmem:[#allocation10 + $0x1b8] sm:$0xff]  ;;  %v151_v13 = vld [vmem:[#allocation10 + $0x1a0] sm:$0xff]  ;;  %v153_v14 = vld [vmem:[#allocation10 + $0x1b0] sm:$0xff] }
  0x57   :  { %251 = vmatprep.subr.mxu0 %v176_v49  ;;  %322 = vmatprep.subr.mxu1 %v178_v50  ;;  %v148_v15 = vld [vmem:[#allocation10 + $0x188] sm:$0xff]  ;;  %v150_v16 = vld [vmem:[#allocation10 + $0x198] sm:$0xff]  ;;  %v147_v17 = vld [vmem:[#allocation10 + $0x180] sm:$0xff] }
  0x58   :  { %252 = vmatpush1.msra.mxu0 %v175_v51  ;;  %323 = vmatpush1.msra.mxu1 %v177_v52  ;;  %v149_v18 = vld [vmem:[#allocation10 + $0x190] sm:$0xff]  ;;  %v144_v19 = vld [vmem:[#allocation10 + $0x168] sm:$0xff]  ;;  %v146_v20 = vld [vmem:[#allocation10 + $0x178] sm:$0xff] }
  0x59   :  { %253 = vmatprep.subr.mxu0 %v172_v53  ;;  %324 = vmatprep.subr.mxu1 %v174_v54  ;;  %v143_v21 = vld [vmem:[#allocation10 + $0x160] sm:$0xff]  ;;  %v145_v22 = vld [vmem:[#allocation10 + $0x170] sm:$0xff]  ;;  %v140_v23 = vld [vmem:[#allocation10 + $0x148] sm:$0xff] }
  0x5a   :  { %254 = vmatpush1.msra.mxu0 %v171_v55  ;;  %325 = vmatpush1.msra.mxu1 %v173_v56  ;;  %v142_v24 = vld [vmem:[#allocation10 + $0x158] sm:$0xff]  ;;  %v139_v25 = vld [vmem:[#allocation10 + $0x140] sm:$0xff]  ;;  %v141_v26 = vld [vmem:[#allocation10 + $0x150] sm:$0xff] }
  0x5b   :  { %255 = vmatprep.subr.mxu0 %v168_v57  ;;  %326 = vmatprep.subr.mxu1 %v170_v58  ;;  %v136_v27 = vld [vmem:[#allocation10 + $0x128] sm:$0xff]  ;;  %v138_v28 = vld [vmem:[#allocation10 + $0x138] sm:$0xff]  ;;  %v135_v29 = vld [vmem:[#allocation10 + $0x120] sm:$0xff] }
  0x5c   :  { %256 = vmatpush1.msra.mxu0 %v167_v59  ;;  %327 = vmatpush1.msra.mxu1 %v169_v60  ;;  %v137_v30 = vld [vmem:[#allocation10 + $0x130] sm:$0xff]  ;;  %v132_v31 = vld [vmem:[#allocation10 + $0x108] sm:$0xff]  ;;  %v134_v32 = vld [vmem:[#allocation10 + $0x118] sm:$0xff] }
  0x5d   :  { %257 = vmatprep.subr.mxu0 %v164_v61  ;;  %328 = vmatprep.subr.mxu1 %v166_v62  ;;  %v131_v33 = vld [vmem:[#allocation10 + $0x100] sm:$0xff]  ;;  %v133_v34 = vld [vmem:[#allocation10 + $0x110] sm:$0xff]  ;;  %v128_v35 = vld [vmem:[#allocation10 + $0xe8] sm:$0xff] }
  0x5e   :  { %258 = vmatpush1.msra.mxu0 %v163_v63  ;;  %329 = vmatpush1.msra.mxu1 %v165_v1  ;;  %v130_v36 = vld [vmem:[#allocation10 + $0xf8] sm:$0xff]  ;;  %v127_v37 = vld [vmem:[#allocation10 + $0xe0] sm:$0xff]  ;;  %v129_v38 = vld [vmem:[#allocation10 + $0xf0] sm:$0xff] }
  0x5f   :  { %292 = vmatmul.mubr.f32.vlgmr.msra.gmra.mxu0 %v93_v2  ;;  %369 = vmatprep.subr.mxu0 %v160_v3  ;;  %v124_v39 = vld [vmem:[#allocation10 + $0xc8] sm:$0xff]  ;;  %v126_v40 = vld [vmem:[#allocation10 + $0xd8] sm:$0xff]  ;;  %v123_v41 = vld [vmem:[#allocation10 + $0xc0] sm:$0xff] }
  0x60   :  { %440 = vmatprep.subr.mxu1 %v162_v4  ;;  %363 = vmatmul.mubr.f32.vlgmr.msra.gmra.mxu1 %v93_v2  ;;  %v125_v42 = vld [vmem:[#allocation10 + $0xd0] sm:$0xff]  ;;  %v120_v43 = vld [vmem:[#allocation10 + $0xa8] sm:$0xff]  ;;  %v122_v44 = vld [vmem:[#allocation10 + $0xb8] sm:$0xff] }
  0x61   :  { %370 = vmatpush1.msra.mxu0 %v159_v5  ;;  %441 = vmatpush1.msra.mxu1 %v161_v6  ;;  %v119_v45 = vld [vmem:[#allocation10 + $0xa0] sm:$0xff]  ;;  %v121_v46 = vld [vmem:[#allocation10 + $0xb0] sm:$0xff]  ;;  %v116_v47 = vld [vmem:[#allocation10 + $0x88] sm:$0xff]  ;;  %v513_v5 = vlaneseq }
  0x62   :  { %371 = vmatprep.subr.mxu0 %v156_v7  ;;  %442 = vmatprep.subr.mxu1 %v158_v8  ;;  %v118_v48 = vld [vmem:[#allocation10 + $0x98] sm:$0xff]  ;;  %v115_v49 = vld [vmem:[#allocation10 + $0x80] sm:$0xff]  ;;  %v117_v50 = vld [vmem:[#allocation10 + $0x90] sm:$0xff] }
  0x63   :  { %372 = vmatpush1.msra.mxu0 %v155_v9  ;;  %443 = vmatpush1.msra.mxu1 %v157_v10  ;;  %v112_v51 = vld [vmem:[#allocation10 + $0x68] sm:$0xff]  ;;  %v114_v52 = vld [vmem:[#allocation10 + $0x78] sm:$0xff]  ;;  %v111_v53 = vld [vmem:[#allocation10 + $0x60] sm:$0xff]  ;;  %v514_v6 = vshrl.u32 %v513_v5, 7 }
  0x64   :  { %373 = vmatprep.subr.mxu0 %v152_v11  ;;  %444 = vmatprep.subr.mxu1 %v154_v12  ;;  %v113_v54 = vld [vmem:[#allocation10 + $0x70] sm:$0xff]  ;;  %v108_v55 = vld [vmem:[#allocation10 + $0x48] sm:$0xff]  ;;  %v110_v56 = vld [vmem:[#allocation10 + $0x58] sm:$0xff] }
  0x65   :  { %374 = vmatpush1.msra.mxu0 %v151_v13  ;;  %445 = vmatpush1.msra.mxu1 %v153_v14  ;;  %v107_v57 = vld [vmem:[#allocation10 + $0x40] sm:$0xff]  ;;  %v109_v58 = vld [vmem:[#allocation10 + $0x50] sm:$0xff]  ;;  %v104_v59 = vld [vmem:[#allocation10 + $0x28] sm:$0xff]  ;;  %v515_v8 = vsub.s32 0, %v514_v6  ;;  %v519_v11 = vsub.s32 1, %v514_v6 }
  0x66   :  { %375 = vmatprep.subr.mxu0 %v148_v15  ;;  %446 = vmatprep.subr.mxu1 %v150_v16  ;;  %v106_v60 = vld [vmem:[#allocation10 + $0x38] sm:$0xff]  ;;  %v103_v61 = vld [vmem:[#allocation10 + $0x20] sm:$0xff]  ;;  %v105_v62 = vld [vmem:[#allocation10 + $0x30] sm:$0xff] }
  0x67   :  { %376 = vmatpush1.msra.mxu0 %v147_v17  ;;  %447 = vmatpush1.msra.mxu1 %v149_v18  ;;  %v100_v63 = vld [vmem:[#allocation10 + $0x8] sm:$0xff]  ;;  %v102_v1 = vld [vmem:[#allocation10 + $0x18] sm:$0xff]  ;;  %v99_v2 = vld [vmem:[#allocation10] sm:$0xff] }
  0x68   :  { %377 = vmatprep.subr.mxu0 %v144_v19  ;;  %448 = vmatprep.subr.mxu1 %v146_v20  ;;  %v101_v3 = vld [vmem:[#allocation10 + $0x10] sm:$0xff]  ;;  %v97_v4 = vld [vmem:[#allocation4] sm:$0xff] }
  0x69   :  { %378 = vmatpush1.msra.mxu0 %v143_v21  ;;  %449 = vmatpush1.msra.mxu1 %v145_v22  ;;  %v511_v9 = vld [vmem:[%s869_s5] sm:$0xf]  ;;  %s788_s5 = smov [#allocation14]  }
  0x6a   :  { %379 = vmatprep.subr.mxu0 %v140_v23  ;;  %450 = vmatprep.subr.mxu1 %v142_v24  ;;  %v516_v13 = vrot.slane %v511_v9, %v515_v8  ;;  %v520_v17 = vrot.slane %v511_v9, %v519_v11  ;;  %v527_v23 = vsub.s32 3, %v514_v6  ;;  %s586_s25 = sshll.u32 %s788_s5, 4  ;;  %s587_s25 = int_to_ptr.vmem [resolvable:$true] %s586_s25 }
  0x6b   :  { %380 = vmatpush1.msra.mxu0 %v139_v25  ;;  %451 = vmatpush1.msra.mxu1 %v141_v26  ;;  %s730_s26 = scalar_lea.vmem %s587_s25, 128  ;;  %p735_p12 = scmp.lt.s32.totalorder %s587_s25, %s587_s25 }
  0x6c   :  { %381 = vmatprep.subr.mxu0 %v136_v27  ;;  %452 = vmatprep.subr.mxu1 %v138_v28  ;;  %v528_v27 = vrot.slane %v511_v9, %v527_v23  ;;  %v523_v28 = vsub.s32 2, %v514_v6  ;;  %p731_p11 = scmp.ne.s32.totalorder %s587_s25, %s730_s26  ;;  %p736_p13 = scmp.lt.s32.totalorder %s730_s26, %s730_s26 }
  0x6d   :  { %382 = vmatpush1.msra.mxu0 %v135_v29  ;;  %453 = vmatpush1.msra.mxu1 %v137_v30 }
  0x6e   :  { %383 = vmatprep.subr.mxu0 %v132_v31  ;;  %454 = vmatprep.subr.mxu1 %v134_v32  ;;  %v524_v31 = vrot.slane %v511_v9, %v523_v28  ;;  %p737_p0 = por %p736_p13, %p735_p12 }
  0x6f   :  { %384 = vmatpush1.msra.mxu0 %v131_v33  ;;  %455 = vmatpush1.msra.mxu1 %v133_v34 }
  0x70   :  { %385 = vmatprep.subr.mxu0 %v128_v35  ;;  %456 = vmatprep.subr.mxu1 %v130_v36  ;;  %p738_p1 = pnand %p737_p0, %p731_p11 }
  0x71   :  { %386 = vmatpush1.msra.mxu0 %v127_v37  ;;  %457 = vmatpush1.msra.mxu1 %v129_v38 }
  0x72   :  { %387 = vmatprep.subr.mxu0 %v124_v39  ;;  %458 = vmatprep.subr.mxu1 %v126_v40  ;;  %v95_v40 = vld [vmem:[#allocation9] sm:$0xff] }
  0x73   :  { %388 = vmatpush1.msra.mxu0 %v123_v41  ;;  %459 = vmatpush1.msra.mxu1 %v125_v42 }
  0x74   :  { %389 = vmatprep.subr.mxu0 %v120_v43  ;;  %460 = vmatprep.subr.mxu1 %v122_v44 }
  0x75   :  { %390 = vmatpush1.msra.mxu0 %v119_v45  ;;  %461 = vmatpush1.msra.mxu1 %v121_v46 }
  0x76   :  { %391 = vmatprep.subr.mxu0 %v116_v47  ;;  %462 = vmatprep.subr.mxu1 %v118_v48 }
  0x77   :  { %392 = vmatpush1.msra.mxu0 %v115_v49  ;;  %463 = vmatpush1.msra.mxu1 %v117_v50 }
  0x78   :  { %393 = vmatprep.subr.mxu0 %v112_v51  ;;  %464 = vmatprep.subr.mxu1 %v114_v52 }
  0x79   :  { %394 = vmatpush1.msra.mxu0 %v111_v53  ;;  %465 = vmatpush1.msra.mxu1 %v113_v54 }
  0x7a   :  { %395 = vmatprep.subr.mxu0 %v108_v55  ;;  %466 = vmatprep.subr.mxu1 %v110_v56 }
  0x7b   :  { %396 = vmatpush1.msra.mxu0 %v107_v57  ;;  %467 = vmatpush1.msra.mxu1 %v109_v58 }
  0x7c   :  { %397 = vmatprep.subr.mxu0 %v104_v59  ;;  %468 = vmatprep.subr.mxu1 %v106_v60 }
  0x7d   :  { %398 = vmatpush1.msra.mxu0 %v103_v61  ;;  %469 = vmatpush1.msra.mxu1 %v105_v62 }
  0x7e   :  { %399 = vmatprep.subr.mxu0 %v100_v63  ;;  %470 = vmatprep.subr.mxu1 %v102_v1 }
  0x7f   :  { %400 = vmatpush1.msra.mxu0 %v99_v2  ;;  %433 = vmatprep.mubr.f32.mxu0 %v787_v0 }
  0x80   :  { %471 = vmatpush1.msra.mxu1 %v101_v3  ;;  %504 = vmatprep.mubr.f32.mxu1 %v787_v0 }
  0x81   :  { %434 = vmatmul.mubr.f32.vlgmr.msra.gmra.mxu0 %v97_v4  ;;  %505 = vmatmul.mubr.f32.vlgmr.msra.gmra.mxu1 %v97_v4 }
 0x11f   :  { %v293_v7 = vpop.f32.mrf.mxu0 }
 0x120   :  { %v364_v10 = vpop.f32.mrf.mxu1 }
 0x121   :  { %v295_v12 = vpop.f32.mrf.mxu0 }
 0x122   :  { %v366_v15 = vpop.f32.mrf.mxu1 }
 0x141   :  { %v435_v14 = vpop.f32.mrf.mxu0  ;;  %v506_v19 = vpop.f32.mrf.mxu1 }
 0x142   :  { %v436_v16 = vadd.f32 %v435_v14, %v293_v7  ;;  %v507_v30 = vadd.f32 %v506_v19, %v364_v10 }
 0x143   :  { %v437_v18 = vpop.f32.mrf.mxu0  ;;  %v508_v25 = vpop.f32.mrf.mxu1 }
 0x144   :  { %v533_v0 = vadd.f32 %v516_v13, %v436_v16  ;;  %v438_v20 = vadd.f32 %v437_v18, %v295_v12  ;;  %v509_v26 = vadd.f32 %v508_v25, %v366_v15  ;;  %v535_v34 = vadd.f32 %v524_v31, %v507_v30 }
 0x146   :  { %v601_v21 = vmul.f32 -1.442695, %v533_v0  ;;  %v534_v22 = vadd.f32 %v520_v17, %v438_v20  ;;  %v536_v29 = vadd.f32 %v528_v27, %v509_v26 }
 0x148   :  { %614 = vpow2.f32 %v601_v21  ;;  %v602_v24 = vmul.f32 -1.442695, %v534_v22  ;;  %v603_v32 = vmul.f32 -1.442695, %v536_v29 }
 0x14a   :  { %616 = vpow2.f32 %v602_v24 }
 0x14b   :  { %618 = vpow2.f32 %v603_v32 }
 0x155   :  { %v615_v33 = vpop.eup %614 }
 0x156   :  { %v540_v35 = vadd.f32 1.0, %v615_v33 }
 0x157   :  { %v617_v36 = vpop.eup %616 }
 0x158   :  { %620 = vrcp.f32 %v540_v35  ;;  %v546_v37 = vadd.f32 1.0, %v617_v36  ;;  %v619_v38 = vpop.eup %618 }
 0x159   :  { %622 = vtanh.f32 %v535_v34  ;;  %v553_v43 = vadd.f32 1.0, %v619_v38 }
 0x15a   :  { %624 = vrcp.f32 %v546_v37 }
 0x15b   :  { %626 = vrcp.f32 %v553_v43 }
 0x165   :  { %v621_v39 = vpop.eup %620 }
 0x166   :  { %v623_v41 = vpop.eup %622 }
 0x167   :  { %v625_v42 = vpop.eup %624  ;;  %v558_v44 = vmul.f32 %v623_v41, %v621_v39 }
 0x168   :  { %v557_v45 = vmul.f32 %v625_v42, %v95_v40 }
 0x16a   :  { %v559_v46 = vadd.f32 %v558_v44, %v557_v45 }
 0x16c   :  { %628 = vtanh.f32 %v559_v46  ;;  %569 = vst [vmem:[#allocation14] sm:$0xff] %v559_v46 }
 0x16d   :  { %741 = shalt.err (!%p738_p1)
}
 0x16e   :  { %589 = dma.vmem_to_hbm [thread:$0]  %s587_s25, 128, %s871_s7, [#allocation15]   ;;  %v627_v47 = vpop.eup %626 }
 0x16f   :  { %s789_s29 = smov [#allocation13]  }
 0x170   :  { %s576_s30 = sshll.u32 %s789_s29, 4  ;;  %s577_s30 = int_to_ptr.vmem [resolvable:$true] %s576_s30 }
 0x171   :  { %s750_s8 = scalar_lea.vmem %s577_s30, 128  ;;  %p755_p3 = scmp.lt.s32.totalorder %s577_s30, %s577_s30 }
 0x172   :  { %p751_p2 = scmp.ne.s32.totalorder %s577_s30, %s750_s8  ;;  %p756_p4 = scmp.lt.s32.totalorder %s750_s8, %s750_s8 }
 0x174   :  { %p757_p5 = por %p756_p4, %p755_p3 }
 0x176   :  { %p758_p6 = pnand %p757_p5, %p751_p2 }
 0x179   :  { %v629_v48 = vpop.eup %628 }
 0x17a   :  { %v561_v49 = vmul.f32 %v629_v48, %v627_v47 }
 0x17c   :  { %564 = vst [vmem:[#allocation13] sm:$0xff] %v561_v49 }
 0x17d   :  { %761 = shalt.err (!%p758_p6)
}
 0x17e   :  { %579 = dma.vmem_to_hbm [thread:$0]  %s577_s30, 128, %s870_s6, [#allocation6]  }
 0x17f   :  { %776 = dma.done.wait [#allocation6], 128  }
 0x180   :  { %777 = vsyncadd [#allocation6], 4294967168 }
 0x181   :  { %778 = dma.done.wait [#allocation15], 128  }
 0x182   :  { %779 = vsyncadd [#allocation15], 4294967168 }
 0x183   :  { %596 = vsyncpa [#allocation5], 1 }
 0x184   :  { %597 = vsyncpa [#allocation8], 1 }
 0x185   :  { %598 = vsyncpa [#allocation11], 1 }
 0x186   :  { %599 = vsyncpa [#allocation6], 1 }
 0x187   :  { %600 = vsyncpa [#allocation15], 1 }

</bundles_post_ra>
